<compile_context>
chip_gen: v6e
topology: v6e:2x2x1
jax: 0.10.0
libtpu: 0.0.40
codegen_flags: <defaults>
</compile_context>

<pallas_src>
import jax
import jax.numpy as jnp
from jax.experimental import pallas as pl
from jax.experimental.pallas import tpu as pltpu


def _round_up(x, m):
    return ((x + m - 1) // m) * m


def _vmem_budget():
    """VMEM budget for tile sizing (bytes), leaving headroom for Mosaic internals."""
    phys = 128 * 1024 * 1024
    try:
        phys = int(pltpu.get_tpu_info().vmem_capacity_bytes)
    except Exception:
        pass
    # ~48 MiB on v7x (64 MiB physical), ~100 MiB on v5e/v6e (128 MiB physical).
    return min(phys - 16 * 1024 * 1024, 100 * 1024 * 1024)


def _tile_footprint(tm, tn, dim_p, out_itemsize, use_scratch):
    """Approximate double-buffered VMEM footprint of one grid step."""
    x_b = 2 * tm * dim_p * 2          # x tile, bf16, double-buffered
    w1_b = 2 * dim_p * tn * 2         # W1 tile, bf16
    w2_b = 2 * tn * dim_p * 2         # W2 tile, bf16
    b_b = 2 * (tn + dim_p) * 4        # biases, f32
    o_b = 2 * tm * dim_p * out_itemsize
    acc_b = tm * dim_p * 4 if use_scratch else 0
    return x_b + w1_b + w2_b + b_b + o_b + acc_b


# ---------------------------------------------------------------------------
# Kernels
# ---------------------------------------------------------------------------
def ffn_kernel_inplace(x_ref, w1_ref, b1_ref, w2_ref, b2_ref, o_ref):
    """Accumulate directly into the (f32) output block resident across the k axis."""
    k = pl.program_id(1)

    @pl.when(k == 0)
    def _():
        # Fold the second Linear's bias into the accumulator init.
        o_ref[...] = jnp.broadcast_to(b2_ref[...], o_ref.shape)

    # Linear 1 for this hidden chunk: bf16 operands on the MXU, f32 accumulation.
    h = jnp.dot(x_ref[...], w1_ref[...],
                preferred_element_type=jnp.float32) + b1_ref[...]
    # SiLU = h * sigmoid(h), kept in f32 (VPU + EUP).  Dropout(p=0) is identity.
    h = h * jax.nn.sigmoid(h)
    # Linear 2 partial product for this hidden chunk, accumulated in f32.
    o_ref[...] += jnp.dot(h.astype(jnp.bfloat16), w2_ref[...],
                          preferred_element_type=jnp.float32)


def ffn_kernel_scratch(x_ref, w1_ref, b1_ref, w2_ref, b2_ref, o_ref, acc_ref):
    """f32 scratch accumulator; used when the output dtype is narrower than f32."""
    k = pl.program_id(1)

    @pl.when(k == 0)
    def _():
        acc_ref[...] = jnp.broadcast_to(b2_ref[...], acc_ref.shape)

    h = jnp.dot(x_ref[...], w1_ref[...],
                preferred_element_type=jnp.float32) + b1_ref[...]
    h = h * jax.nn.sigmoid(h)
    acc_ref[...] += jnp.dot(h.astype(jnp.bfloat16), w2_ref[...],
                            preferred_element_type=jnp.float32)

    @pl.when(k == pl.num_programs(1) - 1)
    def _():
        o_ref[...] = acc_ref[...].astype(o_ref.dtype)


# ---------------------------------------------------------------------------
# Wrapper
# ---------------------------------------------------------------------------
def prepare_ffn_params(w1, b1, w2, b2, *, tn_target=None):
    """Pad + cast weights once (hoisted out of the per-call path).

    w1: (dim, hidden), b1: (1, hidden) or (hidden,), w2: (hidden, dim), b2: (1, dim) or (dim,).
    """
    dim, hidden = w1.shape
    dim_p = _round_up(dim, 128)

    budget = _vmem_budget()
    if tn_target is None:
        tn_target = 1024 if budget > 64 * 1024 * 1024 else 512
    tn = min(tn_target, _round_up(hidden, 128))
    hid_p = _round_up(hidden, tn)          # pad hidden up to a multiple of tn (keep tn large)

    b1 = jnp.asarray(b1).reshape(1, hidden)
    b2 = jnp.asarray(b2).reshape(1, dim)

    w1p = jnp.pad(w1, ((0, dim_p - dim), (0, hid_p - hidden))).astype(jnp.bfloat16)
    b1p = jnp.pad(b1, ((0, 0), (0, hid_p - hidden))).astype(jnp.float32)
    w2p = jnp.pad(w2, ((0, hid_p - hidden), (0, dim_p - dim))).astype(jnp.bfloat16)
    b2p = jnp.pad(b2, ((0, 0), (0, dim_p - dim))).astype(jnp.float32)

    return dict(w1=w1p, b1=b1p, w2=w2p, b2=b2p,
                dim=dim, hidden=hidden, dim_p=dim_p, hid_p=hid_p, tn=tn)


def feed_forward(x, params, *, tm=None):
    """x: (B, N, dim). params from prepare_ffn_params(). Returns (B, N, dim) in x.dtype."""
    dim, hidden = params["dim"], params["hidden"]
    dim_p, hid_p, tn = params["dim_p"], params["hid_p"], params["tn"]
    w1p, b1p, w2p, b2p = params["w1"], params["b1"], params["w2"], params["b2"]

    B, N, xd = x.shape
    assert xd == dim, f"expected last dim {dim}, got {xd}"
    M = B * N

    out_dtype = x.dtype
    out_itemsize = jnp.dtype(out_dtype).itemsize
    use_scratch = out_dtype != jnp.float32   # f32 output -> accumulate in place, no scratch

    budget = _vmem_budget()
    if tm is None:
        tm_target = 1024 if budget > 64 * 1024 * 1024 else 512
        tm = min(tm_target, _round_up(M, 8))
        # Megacore balance: give the 2nd TensorCore work when M is small.
        if _round_up(M, tm) // tm == 1 and M > 8:
            tm = _round_up((M + 1) // 2, 8)
        # Shrink tm until the double-buffered tile footprint fits the VMEM budget.
        while _tile_footprint(tm, tn, dim_p, out_itemsize, use_scratch) > budget and tm > 8:
            tm = max(8, _round_up(tm // 2, 8))

    m_p = _round_up(M, tm)
    n_row_tiles = m_p // tm

    # Activations: cast to bf16 for the MXU; only pad when actually needed.
    x2 = x.reshape(M, dim).astype(jnp.bfloat16)
    needs_pad = (m_p != M) or (dim_p != dim)
    if needs_pad:
        x2 = jnp.pad(x2, ((0, m_p - M), (0, dim_p - dim)))

    flops = 4 * m_p * dim_p * hid_p                    # two matmuls
    transcendentals = m_p * hid_p                      # sigmoid
    bytes_accessed = (x2.size * 2
                      + n_row_tiles * (w1p.size * 2 + w2p.size * 2
                                       + b1p.size * 4 + b2p.size * 4)
                      + m_p * dim_p * out_itemsize)

    kernel = ffn_kernel_scratch if use_scratch else ffn_kernel_inplace
    scratch = [pltpu.VMEM((tm, dim_p), jnp.float32)] if use_scratch else []

    out = pl.pallas_call(
        kernel,
        out_shape=jax.ShapeDtypeStruct((m_p, dim_p), out_dtype),
        grid_spec=pltpu.PrefetchScalarGridSpec(
            num_scalar_prefetch=0,
            grid=(n_row_tiles, hid_p // tn),
            in_specs=[
                pl.BlockSpec((tm, dim_p), lambda i, k: (i, 0)),   # x rows (constant in k)
                pl.BlockSpec((dim_p, tn), lambda i, k: (0, k)),   # W1 hidden chunk
                pl.BlockSpec((1, tn), lambda i, k: (0, k)),       # b1 hidden chunk
                pl.BlockSpec((tn, dim_p), lambda i, k: (k, 0)),   # W2 hidden chunk
                pl.BlockSpec((1, dim_p), lambda i, k: (0, 0)),    # b2 (constant)
            ],
            out_specs=pl.BlockSpec((tm, dim_p), lambda i, k: (i, 0)),
            scratch_shapes=scratch,
        ),
        compiler_params=pltpu.CompilerParams(
            dimension_semantics=("parallel", "arbitrary"),
            vmem_limit_bytes=int(budget),
        ),
        cost_estimate=pl.CostEstimate(
            flops=int(flops),
            transcendentals=int(transcendentals),
            bytes_accessed=int(bytes_accessed),
        ),
    )(x2, w1p, b1p, w2p, b2p)

    if needs_pad:
        out = out[:M, :dim]
    return out.reshape(B, N, dim)


if __name__ == "__main__":
    # Small shapes consistent with the module: dim=32, hidden_dim=64, batch=2, seq=8.
    B, N, dim, hidden = 2, 8, 32, 64
    key = jax.random.PRNGKey(0)
    kx, kw1, kb1, kw2, kb2 = jax.random.split(key, 5)

    x = jax.random.normal(kx, (B, N, dim), dtype=jnp.float32)
    # Deterministic parameter init (synthetic, not a checkpoint load).
    w1 = jax.random.normal(kw1, (dim, hidden), dtype=jnp.float32) * 0.05
    b1 = jax.random.normal(kb1, (1, hidden), dtype=jnp.float32) * 0.01
    w2 = jax.random.normal(kw2, (hidden, dim), dtype=jnp.float32) * 0.05
    b2 = jax.random.normal(kb2, (1, dim), dtype=jnp.float32) * 0.01

    params = prepare_ffn_params(w1, b1, w2, b2)

    y = feed_forward(x, params)
    jax.block_until_ready(y)

    # Pure-JAX f32 reference (Linear -> SiLU -> Linear; dropout p=0 is identity).
    h_ref = x @ w1 + b1[0]
    h_ref = h_ref * jax.nn.sigmoid(h_ref)
    y_ref = h_ref @ w2 + b2[0]
    # bf16 MXU operands introduce a small (~1e-3) drift vs the f32 reference.
    assert jnp.allclose(y, y_ref, atol=2e-2, rtol=2e-2), float(jnp.max(jnp.abs(y - y_ref)))

    # Exercise the bf16-output path (f32 scratch accumulator) as well.
    y_bf16 = feed_forward(x.astype(jnp.bfloat16), params)
    jax.block_until_ready(y_bf16)
    assert jnp.allclose(y_bf16.astype(jnp.float32), y_ref, atol=1e-1, rtol=1e-1)

    print("KERNEL_OK")
</pallas_src>

<mosaic_0001>
module attributes {stable_mosaic.version = 11 : i64} {
  func.func @ffn_kernel_inplace(%arg0: i32, %arg1: i32, %arg2: memref<8x128xbf16, #tpu.memory_space<vmem>>, %arg3: memref<128x128xbf16, #tpu.memory_space<vmem>>, %arg4: memref<1x128xf32, #tpu.memory_space<vmem>>, %arg5: memref<128x128xbf16, #tpu.memory_space<vmem>>, %arg6: memref<1x128xf32, #tpu.memory_space<vmem>>, %arg7: memref<8x128xf32, #tpu.memory_space<vmem>>) attributes {dimension_semantics = [#tpu.dimension_semantics<parallel>, #tpu.dimension_semantics<arbitrary>], iteration_bounds = array<i64: 2, 1>, scalar_prefetch = 0 : i64, scratch_operands = 0 : i64, tpu.core_type = #tpu.core_type<tc>, window_params = [{transform_indices = @transform_0, window_bounds = array<i64: 8, 128>}, {transform_indices = @transform_1, window_bounds = array<i64: 128, 128>}, {transform_indices = @transform_2, window_bounds = array<i64: 1, 128>}, {transform_indices = @transform_3, window_bounds = array<i64: 128, 128>}, {pipeline_mode = #tpu.pipeline_mode<synchronous>, transform_indices = @transform_4, window_bounds = array<i64: 1, 128>}, {transform_indices = @transform_5, window_bounds = array<i64: 8, 128>}]} {
    %c0_i32 = arith.constant 0 : i32
    %0 = arith.cmpi eq, %arg1, %c0_i32 : i32
    %1 = arith.extui %0 : i1 to i32
    %c0_i32_0 = arith.constant 0 : i32
    %2 = arith.cmpi ne, %1, %c0_i32_0 : i32
    scf.if %2 {
      %c0_14 = arith.constant 0 : index
      %c0_15 = arith.constant 0 : index
      %21 = vector.load %arg6[%c0_14, %c0_15] : memref<1x128xf32, #tpu.memory_space<vmem>>, vector<1x128xf32>
      %22 = vector.shape_cast %21 : vector<1x128xf32> to vector<1x128xf32>
      %23 = vector.broadcast %22 : vector<1x128xf32> to vector<8x128xf32>
      %c0_16 = arith.constant 0 : index
      %c0_17 = arith.constant 0 : index
      %24 = vector.load %arg7[%c0_16, %c0_17] : memref<8x128xf32, #tpu.memory_space<vmem>>, vector<8x128xf32>
      tpu.vector_store %arg7[%c0_16, %c0_17], %23 {strides = array<i32>} : memref<8x128xf32, #tpu.memory_space<vmem>>, vector<8x128xf32>,
    } else {
    }
    %c0 = arith.constant 0 : index
    %c0_1 = arith.constant 0 : index
    %3 = vector.load %arg2[%c0, %c0_1] : memref<8x128xbf16, #tpu.memory_space<vmem>>, vector<8x128xbf16>
    %c0_2 = arith.constant 0 : index
    %c0_3 = arith.constant 0 : index
    %4 = vector.load %arg3[%c0_2, %c0_3] : memref<128x128xbf16, #tpu.memory_space<vmem>>, vector<128x128xbf16>
    %cst = arith.constant dense<0.000000e+00> : vector<8x128xf32>
    %5 = tpu.matmul %3, %4, %cst {dimension_numbers = #tpu.dot_dimension_numbers<[1], [0], [0], [1], [0, 0, 1, 1], [], []>} : vector<8x128xbf16>, vector<128x128xbf16>, vector<8x128xf32> -> vector<8x128xf32>
    %c0_4 = arith.constant 0 : index
    %c0_5 = arith.constant 0 : index
    %6 = vector.load %arg4[%c0_4, %c0_5] : memref<1x128xf32, #tpu.memory_space<vmem>>, vector<1x128xf32>
    %7 = vector.broadcast %6 : vector<1x128xf32> to vector<8x128xf32>
    %8 = arith.addf %5, %7 : vector<8x128xf32>
    %9 = arith.negf %8 : vector<8x128xf32>
    %10 = math.exp %9 : vector<8x128xf32>
    %cst_6 = arith.constant 1.000000e+00 : f32
    %11 = vector.broadcast %cst_6 : f32 to vector<8x128xf32>
    %12 = arith.addf %11, %10 : vector<8x128xf32>
    %13 = arith.divf %11, %12 : vector<8x128xf32>
    %14 = arith.mulf %8, %13 : vector<8x128xf32>
    %c0_7 = arith.constant 0 : index
    %c0_8 = arith.constant 0 : index
    %15 = vector.load %arg7[%c0_7, %c0_8] : memref<8x128xf32, #tpu.memory_space<vmem>>, vector<8x128xf32>
    %16 = arith.truncf %14 : vector<8x128xf32> to vector<8x128xbf16>
    %c0_9 = arith.constant 0 : index
    %c0_10 = arith.constant 0 : index
    %17 = vector.load %arg5[%c0_9, %c0_10] : memref<128x128xbf16, #tpu.memory_space<vmem>>, vector<128x128xbf16>
    %cst_11 = arith.constant dense<0.000000e+00> : vector<8x128xf32>
    %18 = tpu.matmul %16, %17, %cst_11 {dimension_numbers = #tpu.dot_dimension_numbers<[1], [0], [0], [1], [0, 0, 1, 1], [], []>} : vector<8x128xbf16>, vector<128x128xbf16>, vector<8x128xf32> -> vector<8x128xf32>
    %19 = arith.addf %15, %18 : vector<8x128xf32>
    %c0_12 = arith.constant 0 : index
    %c0_13 = arith.constant 0 : index
    %20 = vector.load %arg7[%c0_12, %c0_13] : memref<8x128xf32, #tpu.memory_space<vmem>>, vector<8x128xf32>
    tpu.vector_store %arg7[%c0_12, %c0_13], %19 {strides = array<i32>} : memref<8x128xf32, #tpu.memory_space<vmem>>, vector<8x128xf32>,
    return
  }
  func.func @transform_0(%arg0: i32, %arg1: i32) -> (i32, i32) {
    %c0_i32 = arith.constant 0 : i32
    %c0_i32_0 = arith.constant 0 : i32
    return %arg0, %c0_i32 : i32, i32
  }
  func.func @transform_1(%arg0: i32, %arg1: i32) -> (i32, i32) {
    %c0_i32 = arith.constant 0 : i32
    %c0_i32_0 = arith.constant 0 : i32
    return %c0_i32, %arg1 : i32, i32
  }
  func.func @transform_2(%arg0: i32, %arg1: i32) -> (i32, i32) {
    %c0_i32 = arith.constant 0 : i32
    %c0_i32_0 = arith.constant 0 : i32
    return %c0_i32, %arg1 : i32, i32
  }
  func.func @transform_3(%arg0: i32, %arg1: i32) -> (i32, i32) {
    %c0_i32 = arith.constant 0 : i32
    %c0_i32_0 = arith.constant 0 : i32
    return %arg1, %c0_i32 : i32, i32
  }
  func.func @transform_4(%arg0: i32, %arg1: i32) -> (i32, i32) {
    %c0_i32 = arith.constant 0 : i32
    %c0_i32_0 = arith.constant 0 : i32
    %c0_i32_1 = arith.constant 0 : i32
    return %c0_i32, %c0_i32_0 : i32, i32
  }
  func.func @transform_5(%arg0: i32, %arg1: i32) -> (i32, i32) {
    %c0_i32 = arith.constant 0 : i32
    %c0_i32_0 = arith.constant 0 : i32
    return %arg0, %c0_i32 : i32, i32
  }
}

</mosaic_0001>

<bundles_post_ra>
// kernel: tpu_custom_call.1
= control target key start
LH: loop header
LB: loop body
LE: loop exit
PB: predicated region body
PF: predicated region fallthrough
CT: control target
= control target key end

     0   :  { %s1280_s0 = inlined_call_operand.hbm [shape: bf16[16,128], index: 0, kind: input, shape index: {}]   ;;  %s1281_s1 = inlined_call_operand.hbm [shape: bf16[128,128], index: 1, kind: input, shape index: {}]   ;;  %s1282_s2 = inlined_call_operand.vmem [shape: f32[1,128], index: 2, kind: input, shape index: {}]   ;;  %s1283_s3 = inlined_call_operand.hbm [shape: bf16[128,128], index: 3, kind: input, shape index: {}]   ;;  %s1284_s4 = inlined_call_operand.vmem [shape: f32[1,128], index: 4, kind: input, shape index: {}]   ;;  %s1285_s5 = inlined_call_operand.hbm [shape: f32[16,128], index: 5, kind: output, shape index: {}]  }
   0x1   :  { %1289 = sst [smem:[#allocation12_spill]] %s1281_s1 }
   0x2   :  { %10 = vsyncpa [#allocation3], 0 }
   0x3   :  { %12 = vsyncpa [#allocation3 + $0x1], 0 }
   0x4   :  { %13 = vsyncpa [#allocation6], 0 }
   0x5   :  { %14 = vsyncpa [#allocation4], 0 }
   0x6   :  { %16 = vsyncpa [#allocation4 + $0x1], 0  ;;  %s1084_s18 = smov 0   ;;  %s1086_s19 = smov 0  }
   0x7   :  { %s1088_s20 = smov 0   ;;  %s1090_s21 = smov 0  }
   0x8   :  { %s1092_s22 = smov 0   ;;  %s1094_s23 = smov 0  }
   0x9 LB: > { %s678_s24 = sadd.s32 4294967295, %s1044_s23   ;;  %s679_s25 = sadd.s32 4294967294, %s1044_s23   ;;  %s1044_s23 = sphi %s1094_s23, %s22_s23   ;;  %s1040_s22 = sphi %s1092_s22, %s1307_s22   ;;  %s1036_s21 = sphi %s1090_s21, %s1306_s21   ;;  %s1032_s20 = sphi %s1088_s20, %s1305_s20   ;;  %s1028_s19 = sphi %s1086_s19, %s1304_s19   ;;  %s1024_s18 = sphi %s1084_s18, %s1303_s18  }
   0xa   : > { %p54_p0 = scmp.ne.s32.totalorder %s1028_s19, %s1024_s18  ;;  %p1118_p1 = scmp.eq.s32.totalorder %s678_s24, 0 }
   0xb   : > { %p1122_p2 = scmp.eq.s32.totalorder %s678_s24, 1  ;;  %p183_p3 = scmp.eq.s32.totalorder %s679_s25, 1 }
   0xc   : > { %s1290_s26 = scalar_select %p1118_p1, 1, 0 }
   0xd   : > { %p1128_p4 = por %p1118_p1, %p54_p0  ;;  %p680_p5 = scmp.ge.s32.totalorder %s1044_s23, 1 }
   0xe   : > { %p1133_p6 = por %p183_p3, %p54_p0  ;;  %p190_p7 = scmp.lt.s32.totalorder %s1044_s23, 3 }
   0xf   : > { %s1292_s28 = scalar_select %p1128_p4, 1, 0 }
  0x10   : > { %s1293_s29 = scalar_select %p1133_p6, 1, 0 }
  0x11   : > { %p1138_p8 = pnand %p680_p5, %p190_p7  ;;  %s1046_s6 = smov [#allocation5]  }
  0x12   : > { %s204_s7 = sshll.u32 %s1046_s6, 4  ;;  %s1047_s9 = smov [#allocation7]   ;;  %s205_s7 = int_to_ptr.vmem [resolvable:$true] %s204_s7 }
  0x13   : > { %p785_p9 = pneg %p1138_p8  ;;  %s226_s10 = sshll.u32 %s1047_s9, 4  ;;  %s227_s10 = int_to_ptr.vmem [resolvable:$true] %s226_s10 }
  0x14   : > { %s891_s11 = scalar_lea.vmem %s205_s7, 1024  ;;  %p899_p5 = scmp.lt.s32.totalorder %s205_s7, %s205_s7 }
  0x15   : > { %p1147_p11 = pnand %p785_p9, %p1118_p1  ;;  %p892_p13 = scmp.ne.s32.totalorder %s205_s7, %s891_s11 }
  0x16   : > { %p900_p7 = scmp.lt.s32.totalorder %s891_s11, %s891_s11 }
  0x17   : > { %p882_p12 = pneg %p1147_p11 }
  0x18   : > { %p901_p10 = por %p900_p7, %p899_p5 }
  0x19   : > { %p894_p0 = pnand %p892_p13, %p882_p12 }
  0x1b   : > { %p895_p3 = pneg %p894_p0 }
  0x1d   : > { %p902_p9 = pnand %p901_p10, %p895_p3 }
  0x1f   : > { %905 = shalt.err (!%p902_p9)
}
  0x20   : > { %s1048_s12 = smov 64   ;;  %s1049_s13 = smov 4  }
  0x21   : > { %s1296_s1 = sld [smem:[#allocation12_spill]]  ;;  %s917_s16 = scalar_lea.vmem %s227_s10, 1024 }
  0x22   : > { %p918_p6 = scmp.ne.s32.totalorder %s227_s10, %s917_s16  ;;  %p925_p1 = scmp.lt.s32.totalorder %s227_s10, %s227_s10 }
  0x23   : > { %p926_p4 = scmp.lt.s32.totalorder %s917_s16, %s917_s16 }
  0x24   : > { %p920_p13 = pnand %p918_p6, %p882_p12 }
  0x25   : > { %p927_p5 = por %p926_p4, %p925_p1 }
  0x26   : > { %p921_p0 = pneg %p920_p13 }
  0x27   : > { %788 = dma.hbm_to_vmem [thread:$0]  (!%p1147_p11), %s1296_s1, 1024, %s205_s7, [#allocation6], %s1048_s12, %s1048_s12, %s1049_s13  }
  0x28   : > { %p928_p10 = pnand %p927_p5, %p921_p0 }
  0x2a   : > { %931 = shalt.err (!%p928_p10)
}
  0x2b   : > { %791 = dma.hbm_to_vmem [thread:$0]  (!%p1147_p11), %s1283_s3, 1024, %s227_s10, [#allocation6], %s1048_s12, %s1048_s12, %s1049_s13  }
  0x2c   : > { %s34_s25 = sadd.s32 1, %s1040_s22  ;;  %s41_s6 = sadd.s32 1, %s1032_s20 }
  0x2d   : > { %p36_p1 = scmp.ge.s32.totalorder %s34_s25, 2  ;;  %p48_p4 = scmp.ne.s32.totalorder %s1032_s20, %s1028_s19 }
  0x2e   : > { %p49_p6 = scmp.eq.s32.totalorder %s1044_s23, 0  ;;  %p802_p12 = scmp.lt.s32.totalorder %s1044_s23, 2 }
  0x2f   : > { %s1309_s25 = smov (%p36_p1, %s34_s25), 0  ;;  %p1179_p7 = por %p1122_p2, %p48_p4 }
  0x30   : > { %p50_p3 = por %p49_p6, %p48_p4  ;;  %s38_s8 = ssub.s32 %s1040_s22, %s1309_s25 }
  0x31   : > { %s243_s9 = sand.u32 1, %s1032_s20   ;;  %p39_p9 = scmp.eq.s32.totalorder %s38_s8, 0 }
  0x32   : > { %s685_s10 = sshll.u32 %s243_s9, 2  ;;  %s686_s11 = sshll.u32 %s1040_s22, 6 }
  0x33   : > { %s1188_s12 = scalar_select %p39_p9, %s1032_s20, %s41_s6  }
  0x34   : > { %s252_s15 = scalar_lea.hbm %s1280_s0, %s686_s11  ;;  %s247_s16 = scalar_lea.vmem [#allocation2], %s685_s10 }
  0x35   : > { %s254_s17 = sshll.u32 %s247_s16, 4  ;;  %p1195_p11 = pnand %p802_p12, %p50_p3  ;;  %s255_s17 = int_to_ptr.vmem [resolvable:$true] %s254_s17 }
  0x36   : > { %s244_s24 = scalar_lea.sflag [#allocation3], %s243_s9  ;;  %s945_s8 = scalar_lea.vmem %s255_s17, 64 }
  0x37   : > { %p934_p2 = pneg %p1195_p11  ;;  %p946_p13 = scmp.ne.s32.totalorder %s255_s17, %s945_s8 }
  0x38   : > { %s1050_s6 = smov [#allocation2]  }
  0x39   : > { %p948_p0 = pnand %p946_p13, %p934_p2  ;;  %s950_s1 = sshll.u32 %s1050_s6, 4  ;;  %s951_s1 = int_to_ptr.vmem [resolvable:$false] %s950_s1 }
  0x3a   : > { %s952_s11 = scalar_lea.vmem %s951_s1, 128  ;;  %p953_p10 = scmp.lt.s32.totalorder %s255_s17, %s951_s1 }
  0x3b   : > { %p949_p5 = pneg %p948_p0  ;;  %p954_p1 = scmp.lt.s32.totalorder %s952_s11, %s945_s8 }
  0x3d   : > { %p955_p4 = por %p954_p1, %p953_p10 }
  0x3f   : > { %p956_p6 = pnand %p955_p4, %p949_p5 }
  0x41   : > { %959 = shalt.err (!%p956_p6)
}
  0x42   : > { %795 = dma.hbm_to_vmem [thread:$0]  (!%p1195_p11), %s252_s15, 64, %s255_s17, %s244_s24  }
  0x43   : > { %263 = sbr.rel (%p1138_p8) target bundleno = 550 (0x226), region = 40  ;;  %s1206_s9 = sand.u32 (!%p1138_p8), 1, %s1028_s19  }
  0x44   : > { %s688_s10 = sshll.u32 (!%p1138_p8), %s1206_s9, 2  ;;  %s266_s13 = scalar_lea.sflag (!%p1138_p8), [#allocation3], %s1206_s9 }
  0x45   : > { %s1210_s14 = scalar_lea.vmem (!%p1138_p8), [#allocation2], %s688_s10  ;;  %p1299_p12 = scmp.ne.s32.totalorder (!%p1138_p8), %s1292_s28, 0 }
  0x48   : > { %1011 = dma.done.wait (%p1299_p12), %s266_s13, 64  }
  0x49   : > { %1013 = vsyncadd (%p1299_p12), %s266_s13, 4294967232  ;;  %p1300_p3 = scmp.ne.s32.totalorder %s1290_s26, 0 }
  0x4b   : > { %1015 = dma.done.wait (%p1300_p3), [#allocation6], 2048  }
  0x4c   : > { %1017 = vsyncadd (%p1300_p3), [#allocation6], 4294965248  ;;  %v1051_v0 = vmov 0.0   ;;  %vm1052_vm0 = vmmov 0   ;;  %v860_v1 = vld [vmem:[#allocation5 + $0x38] sm:$0xff]   ;;  %v861_v2 = vld [vmem:[#allocation5 + $0x30] sm:$0xff]  }
  0x4d   : > { %733 = vmatprep.subr.bf16.mxu0 %v1051_v0  ;;  %749 = vmatprep.mubr.msk.bf16.mxu0 %vm1052_vm0, %v1051_v0  ;;  %v862_v3 = vld [vmem:[#allocation5 + $0x28] sm:$0xff]   ;;  %v863_v4 = vld [vmem:[#allocation5 + $0x20] sm:$0xff]   ;;  %v864_v5 = vld [vmem:[#allocation5 + $0x18] sm:$0xff]   ;;  %s691_s28 = sshll.u32 %s1206_s9, 3  ;;  %s712_s16 = sshll.u32 %s1036_s21, 7 }
  0x4e   : > { %753 = vmatprep.subr.bf16.mxu1 %v1051_v0  ;;  %769 = vmatprep.mubr.msk.bf16.mxu1 %vm1052_vm0, %v1051_v0  ;;  %v865_v6 = vld [vmem:[#allocation5 + $0x10] sm:$0xff]   ;;  %v866_v7 = vld [vmem:[#allocation5 + $0x8] sm:$0xff]   ;;  %v867_v8 = vld [vmem:[#allocation5] sm:$0xff]   ;;  %s306_s17 = scalar_lea.vmem [#allocation8], %s691_s28  ;;  %s1232_s6 = scalar_lea.hbm %s1285_s5, %s712_s16 }
  0x4f   : > { %734 = vmatpush3.bf16.msra.mxu0 %v860_v1  ;;  %v324_v9 = vld [vmem:[%s1210_s14] sm:$0xf]  ;;  %v869_v11 = vld [vmem:[#allocation7 + $0x30] sm:$0xff]   ;;  %v870_v12 = vld [vmem:[#allocation7 + $0x28] sm:$0xff]   ;;  %s565_s27 = sshll.u32 %s306_s17, 4  ;;  %s552_s11 = scalar_lea.sflag [#allocation4], %s1206_s9  ;;  %s1234_s27 = int_to_ptr.vmem [resolvable:$true] %s565_s27 }
  0x50   : > { %735 = vmatprep.subr.bf16.mxu0 %v1051_v0  ;;  %v868_v10 = vld [vmem:[#allocation7 + $0x38] sm:$0xff]   ;;  %v871_v13 = vld [vmem:[#allocation7 + $0x20] sm:$0xff]   ;;  %v873_v15 = vld [vmem:[#allocation7 + $0x10] sm:$0xff]   ;;  %s960_s10 = scalar_lea.vmem %s1234_s27, 128  ;;  %s1053_s21 = smov [#allocation8]  }
  0x51   : > { %754 = vmatpush3.bf16.msra.mxu1 %v868_v10  ;;  %v872_v14 = vld [vmem:[#allocation7 + $0x18] sm:$0xff]   ;;  %v874_v16 = vld [vmem:[#allocation7 + $0x8] sm:$0xff]   ;;  %v875_v17 = vld [vmem:[#allocation7] sm:$0xff]   ;;  %p961_p8 = scmp.ne.s32.totalorder %s1234_s27, %s960_s10  ;;  %s964_s13 = sshll.u32 %s1053_s21, 4  ;;  %s965_s13 = int_to_ptr.vmem [resolvable:$false] %s964_s13 }
  0x52   : > { %755 = vmatprep.subr.bf16.mxu1 %v1051_v0  ;;  %v693_v18 = vld [vmem:[%s1282_s2] ss:$0 sm:$0xff]  ;;  %s966_s14 = scalar_lea.vmem %s965_s13, 256  ;;  %p967_p2 = scmp.lt.s32.totalorder %s1234_s27, %s965_s13 }
  0x53   : > { %736 = vmatpush3.bf16.msra.mxu0 %v861_v2  ;;  %v692_v30 = vld [vmem:[%s1284_s4] ss:$0 sm:$0xff]  ;;  %p962_p9 = pnand %p961_p8, %p1179_p7  ;;  %p968_p13 = scmp.lt.s32.totalorder %s966_s14, %s960_s10 }
  0x54   : > { %737 = vmatprep.subr.bf16.mxu0 %v1051_v0 }
  0x55   : > { %756 = vmatpush3.bf16.msra.mxu1 %v869_v11  ;;  %p963_p11 = pneg %p962_p9  ;;  %p969_p0 = por %p968_p13, %p967_p2 }
  0x56   : > { %757 = vmatprep.subr.bf16.mxu1 %v1051_v0 }
  0x57   : > { %738 = vmatpush3.bf16.msra.mxu0 %v862_v3  ;;  %p970_p5 = pnand %p969_p0, %p963_p11 }
  0x58   : > { %739 = vmatprep.subr.bf16.mxu0 %v1051_v0 }
  0x59   : > { %758 = vmatpush3.bf16.msra.mxu1 %v870_v12 }
  0x5a   : > { %759 = vmatprep.subr.bf16.mxu1 %v1051_v0 }
  0x5b   : > { %740 = vmatpush3.bf16.msra.mxu0 %v863_v4 }
  0x5c   : > { %741 = vmatprep.subr.bf16.mxu0 %v1051_v0 }
  0x5d   : > { %760 = vmatpush3.bf16.msra.mxu1 %v871_v13 }
  0x5e   : > { %761 = vmatprep.subr.bf16.mxu1 %v1051_v0 }
  0x5f   : > { %742 = vmatpush3.bf16.msra.mxu0 %v864_v5 }
  0x60   : > { %743 = vmatprep.subr.bf16.mxu0 %v1051_v0 }
  0x61   : > { %762 = vmatpush3.bf16.msra.mxu1 %v872_v14 }
  0x62   : > { %763 = vmatprep.subr.bf16.mxu1 %v1051_v0 }
  0x63   : > { %744 = vmatpush3.bf16.msra.mxu0 %v865_v6 }
  0x64   : > { %745 = vmatprep.subr.bf16.mxu0 %v1051_v0 }
  0x65   : > { %764 = vmatpush3.bf16.msra.mxu1 %v873_v15 }
  0x66   : > { %765 = vmatprep.subr.bf16.mxu1 %v1051_v0 }
  0x67   : > { %746 = vmatpush3.bf16.msra.mxu0 %v866_v7 }
  0x68   : > { %747 = vmatprep.subr.bf16.mxu0 %v1051_v0 }
  0x69   : > { %766 = vmatpush3.bf16.msra.mxu1 %v874_v16 }
  0x6a   : > { %767 = vmatprep.subr.bf16.mxu1 %v1051_v0 }
  0x6b   : > { %748 = vmatpush3.bf16.msra.mxu0 %v867_v8 }
  0x6d   : > { %768 = vmatpush3.bf16.msra.mxu1 %v875_v17 }
  0x6e   : > { %750 = vmatmul.mubr.bf16.vlgmr.msra.gmra.mxu0 %v324_v9 }
 0x12e   : > { %v430_v19 = vpop.f32.mrf.mxu0 }
 0x12f   : > { %v431_v20 = vadd.f32 %v693_v18, %v430_v19 }
 0x130   : > { %v751_v21 = vpop.f32.mrf.mxu0 }
 0x131   : > { %v702_v22 = vmul.f32 -1.442695, %v431_v20 }
 0x132   : > { %v433_v23 = vpop.f32.mrf.mxu0 }
 0x133   : > { %876 = vpow2.f32 %v702_v22 }
 0x134   : > { %v752_v24 = vpop.f32.mrf.mxu0 }
 0x140   : > { %v877_v25 = vpop.eup %876 }
 0x141   : > { %v439_v26 = vadd.f32 1.0, %v877_v25 }
 0x143   : > { %878 = vrcp.f32 %v439_v26 }
 0x150   : > { %v879_v27 = vpop.eup %878 }
 0x151   : > { %v442_v28 = vmul.f32 %v879_v27, %v431_v20 }
 0x153   : > { %v444_v29 = vpack.c.bf16 %v442_v28, %v442_v28 }
 0x155   : > { %770 = vmatmul.mubr.bf16.vlgmr.msra.gmra.mxu1 %v444_v29 }
 0x215   : > { %v543_v31 = vpop.f32.mrf.mxu1 }
 0x216   : > { %v549_v32 = vadd.f32 %v692_v30, %v543_v31 }
 0x217   : > { %v771_v33 = vpop.f32.mrf.mxu1 }
 0x218   : > { %550 = vst [vmem:[%s306_s17] sm:$0xff] %v549_v32 }
 0x219   : > { %v546_v34 = vpop.f32.mrf.mxu1 }
 0x21a   : > { %973 = shalt.err (!%p970_p5)
}
 0x21b   : > { %s974_s1 = scalar_lea.hbm %s1232_s6, 128  ;;  %s978_s28 = scalar_lea.hbm %s1285_s5, 256 }
 0x21c   : > { %p975_p10 = scmp.ne.s32.totalorder %s1232_s6, %s974_s1  ;;  %p979_p6 = scmp.lt.s32.totalorder %s1232_s6, %s1285_s5 }
 0x21d   : > { %p980_p12 = scmp.lt.s32.totalorder %s978_s28, %s974_s1 }
 0x21e   : > { %p976_p1 = pnand %p975_p10, %p1179_p7 }
 0x21f   : > { %p981_p3 = por %p980_p12, %p979_p6 }
 0x220   : > { %p977_p4 = pneg %p976_p1 }
 0x222   : > { %p982_p8 = pnand %p981_p3, %p977_p4 }
 0x224   : > { %985 = shalt.err (!%p982_p8)
}
 0x225   : > { %783 = dma.vmem_to_hbm [thread:$0]  (%p1179_p7), %s1234_s27, 128, %s1232_s6, %s552_s11   ;;  %v772_v35 = vpop.f32.mrf.mxu1 }
 0x226 PF: > { %s577_s16 = sand.u32 1, %s1024_s18   ;;  %p1301_p9 = scmp.ne.s32.totalorder %s1293_s29, 0 }
 0x227   : > { %p1302_p11 = scmp.ge.s32.totalorder %s1044_s23, 2  ;;  %s578_s17 = scalar_lea.sflag [#allocation4], %s577_s16 }
 0x229   : > { %p797_p2 = pnand %p1302_p11, %p1301_p9 }
 0x22b   : > { %p798_p13 = pneg %p797_p2 }
 0x22d   : > { %1019 = dma.done.wait (%p798_p13), %s578_s17, 128  }
 0x22e   : > { %1021 = vsyncadd (%p798_p13), %s578_s17, 4294967168  ;;  %s22_s23 = sadd.s32 1, %s1044_s23   ;;  %s1303_s18 = smov %s1028_s19 }
 0x22f   : > { %p19_p0 = scmp.ge.s32.totalorder %s22_s23, 4   ;;  %s1304_s19 = smov %s1032_s20 }
 0x230   : > { %s1305_s20 = smov %s1188_s12  ;;  %s1306_s21 = smov %s1040_s22 }
 0x231   : > { %s1307_s22 = smov %s1309_s25  ;;  %21 = sbr.rel (!%p19_p0) target bundleno = 9 (0x9), region = 102 }
 0x236   :  { %583 = vsyncpa [#allocation3], 1 }
 0x237   :  { %585 = vsyncpa [#allocation3 + $0x1], 1 }
 0x238   :  { %586 = vsyncpa [#allocation6], 1 }
 0x239   :  { %587 = vsyncpa [#allocation4], 1 }
 0x23a   :  { %589 = vsyncpa [#allocation4 + $0x1], 1 }

</bundles_post_ra>
